<compile_context>
chip_gen: v7x
topology: tpu7x:2x2x1
jax: 0.10.0
libtpu: 0.0.40
codegen_flags: <defaults>
</compile_context>

<pallas_src>
import jax
import jax.numpy as jnp
from jax.experimental import pallas as pl
from jax.experimental.pallas import tpu as pltpu


# -----------------------------------------------------------------------------
# Pallas kernel: 1x1 conv (== channel matmul) + bias + ReLU, Nb images per step
# -----------------------------------------------------------------------------
def _conv1x1_relu_kernel(x_ref, w_ref, b_ref, o_ref):
    # x_ref: (Nb, Cin, HW_blk)  -- Nb images, channels-major (native NCHW)
    # w_ref: (Cout, Cin)
    # b_ref: (Cout, 1)
    # o_ref: (Nb, Cout, HW_blk) -- lane-dense (HW_blk % 128 == 0)
    w = w_ref[...]
    b = b_ref[...]
    # Static unroll over the (small) per-step batch: one MXU matmul per image,
    # no in-kernel relayouts, f32 accumulate, bias broadcast over lanes, ReLU.
    for i in range(x_ref.shape[0]):
        acc = jnp.dot(w, x_ref[i], preferred_element_type=jnp.float32)
        acc = jnp.maximum(acc + b, 0.0)
        o_ref[i] = acc.astype(o_ref.dtype)


def conv1x1_relu_nchw(x_nchw, weight, bias):
    """x_nchw: (N, Cin, H, W); weight: (Cout, Cin); bias: (Cout,)."""
    N, Cin, H, W = x_nchw.shape
    Cout = weight.shape[0]
    HW = H * W
    itemsize = jnp.dtype(x_nchw.dtype).itemsize

    # ---- lane-density guard: spatial (lane) extent must be a multiple of 128
    LANE = 128
    hw128 = ((HW + LANE - 1) // LANE) * LANE

    # Lane-dense spatial tile (multiple of 128, full extent when small).
    hw_blk = min(hw128, 8192)
    hw_pad = ((hw128 + hw_blk - 1) // hw_blk) * hw_blk
    num_hw_blocks = hw_pad // hw_blk

    # Batch tile: target a few MiB of data movement per grid step (HBM-bound
    # roofline knee), bounded by a small static-unroll cap. At the spec size
    # (N=2, 16x16) this puts the whole batch into a single grid step.
    per_image_bytes = (Cin + Cout) * hw_blk * itemsize
    nb = int(max(1, min(N, 8, (4 << 20) // max(per_image_bytes, 1))))
    n_pad = ((N + nb - 1) // nb) * nb
    num_n_blocks = n_pad // nb

    x2 = x_nchw.reshape(N, Cin, HW)            # free row-major reshape
    pad_n, pad_hw = n_pad - N, hw_pad - HW
    if pad_n or pad_hw:
        x2 = jnp.pad(x2, ((0, pad_n), (0, 0), (0, pad_hw)))
    b2 = bias.reshape(Cout, 1)

    flops = 2 * n_pad * Cout * Cin * hw_pad
    bytes_accessed = (n_pad * (Cin + Cout) * hw_pad + Cout * Cin + Cout) * itemsize

    out = pl.pallas_call(
        _conv1x1_relu_kernel,
        out_shape=jax.ShapeDtypeStruct((n_pad, Cout, hw_pad), x_nchw.dtype),
        grid_spec=pltpu.PrefetchScalarGridSpec(
            num_scalar_prefetch=0,
            grid=(num_n_blocks, num_hw_blocks),
            in_specs=[
                pl.BlockSpec((nb, Cin, hw_blk), lambda n, s: (n, 0, s)),
                pl.BlockSpec((Cout, Cin), lambda n, s: (0, 0)),
                pl.BlockSpec((Cout, 1), lambda n, s: (0, 0)),
            ],
            out_specs=pl.BlockSpec((nb, Cout, hw_blk), lambda n, s: (n, 0, s)),
        ),
        compiler_params=pltpu.CompilerParams(
            # Both axes are independent: on v7x either axis feeds the second
            # TensorCore; on v5e/v6e a single TC just loops (parallel vs
            # arbitrary is ~0.1% there — the win came from collapsing steps).
            dimension_semantics=("parallel", "parallel"),
        ),
        cost_estimate=pl.CostEstimate(
            flops=flops, transcendentals=0, bytes_accessed=bytes_accessed
        ),
    )(x2, weight, b2)

    out = out[:N, :, :HW]                      # drop padding (no-op here)
    return out.reshape(N, Cout, H, W)          # free reshape back to NCHW


# -----------------------------------------------------------------------------
# Conv1x1_ReLU module equivalent
# -----------------------------------------------------------------------------
class Conv1x1ReLUJax:
    def __init__(self, in_channels, out_channels, key=jax.random.PRNGKey(42)):
        kw, kb = jax.random.split(key)
        fan_in = in_channels * 1 * 1
        bound = (1.0 / fan_in) ** 0.5   # matches nn.Conv2d default init bounds
        self.weight = jax.random.uniform(
            kw, (out_channels, in_channels), jnp.float32, -bound, bound
        )
        self.bias = jax.random.uniform(
            kb, (out_channels,), jnp.float32, -bound, bound
        )
        # registered buffer from the reference module (scalar bookkeeping)
        self.latency = jnp.array(0.5, dtype=jnp.float32)

    def __call__(self, x_nchw):
        return conv1x1_relu_nchw(x_nchw, self.weight, self.bias)

    def getLatency(self):
        return self.latency


# -----------------------------------------------------------------------------
# Reference check (pure JAX) + driver
# -----------------------------------------------------------------------------
def _ref_conv1x1_relu_nchw(x_nchw, weight_oc, bias):
    w_oihw = weight_oc.reshape(weight_oc.shape[0], weight_oc.shape[1], 1, 1)
    y = jax.lax.conv_general_dilated(
        x_nchw, w_oihw, window_strides=(1, 1), padding="VALID",
        dimension_numbers=("NCHW", "OIHW", "NCHW"),
    )
    y = y + bias.reshape(1, -1, 1, 1)
    return jnp.maximum(y, 0.0)


if __name__ == "__main__":
    key = jax.random.PRNGKey(0)
    x = jax.random.normal(key, (2, 4, 16, 16), dtype=jnp.float32)  # NCHW

    mod = Conv1x1ReLUJax(in_channels=4, out_channels=8)
    y = mod(x)
    y = jax.block_until_ready(y)

    y_ref = _ref_conv1x1_relu_nchw(x, mod.weight, mod.bias)
    assert y.shape == (2, 8, 16, 16), y.shape
    assert jnp.allclose(y, y_ref, atol=1e-5, rtol=1e-5), \
        float(jnp.max(jnp.abs(y - y_ref)))

    # scalar bookkeeping path (not a kernel)
    lat = mod.getLatency()
    assert float(lat) == 0.5

    print("KERNEL_OK")
</pallas_src>

<mosaic_0001>
module attributes {stable_mosaic.version = 11 : i64} {
  func.func @_conv1x1_relu_kernel(%arg0: i32, %arg1: i32, %arg2: memref<2x4x256xf32, #tpu.memory_space<vmem>>, %arg3: memref<8x4xf32, #tpu.memory_space<vmem>>, %arg4: memref<8x1xf32, #tpu.memory_space<vmem>>, %arg5: memref<2x8x256xf32, #tpu.memory_space<vmem>>) attributes {dimension_semantics = [#tpu.dimension_semantics<parallel>, #tpu.dimension_semantics<parallel>], iteration_bounds = array<i64: 1, 1>, scalar_prefetch = 0 : i64, scratch_operands = 0 : i64, tpu.core_type = #tpu.core_type<tc>, window_params = [{transform_indices = @transform_0, window_bounds = array<i64: 2, 4, 256>}, {pipeline_mode = #tpu.pipeline_mode<synchronous>, transform_indices = @transform_1, window_bounds = array<i64: 8, 4>}, {pipeline_mode = #tpu.pipeline_mode<synchronous>, transform_indices = @transform_2, window_bounds = array<i64: 8, 1>}, {transform_indices = @transform_3, window_bounds = array<i64: 2, 8, 256>}]} {
    %c0 = arith.constant 0 : index
    %c0_0 = arith.constant 0 : index
    %0 = vector.load %arg3[%c0, %c0_0] : memref<8x4xf32, #tpu.memory_space<vmem>>, vector<8x4xf32>
    %c0_1 = arith.constant 0 : index
    %c0_2 = arith.constant 0 : index
    %1 = vector.load %arg4[%c0_1, %c0_2] : memref<8x1xf32, #tpu.memory_space<vmem>>, vector<8x1xf32>
    %c0_3 = arith.constant 0 : index
    %c0_4 = arith.constant 0 : index
    %c0_5 = arith.constant 0 : index
    %2 = vector.load %arg2[%c0_3, %c0_4, %c0_5] : memref<2x4x256xf32, #tpu.memory_space<vmem>>, vector<1x4x256xf32>
    %3 = vector.shape_cast %2 : vector<1x4x256xf32> to vector<4x256xf32>
    %cst = arith.constant dense<0.000000e+00> : vector<8x256xf32>
    %4 = tpu.matmul %0, %3, %cst {dimension_numbers = #tpu.dot_dimension_numbers<[1], [0], [0], [1], [0, 0, 1, 1], [], []>} : vector<8x4xf32>, vector<4x256xf32>, vector<8x256xf32> -> vector<8x256xf32>
    %5 = vector.broadcast %1 : vector<8x1xf32> to vector<8x256xf32>
    %6 = arith.addf %4, %5 : vector<8x256xf32>
    %cst_6 = arith.constant 0.000000e+00 : f32
    %7 = vector.broadcast %cst_6 : f32 to vector<8x256xf32>
    %8 = arith.maximumf %6, %7 : vector<8x256xf32>
    %c0_7 = arith.constant 0 : index
    %c0_8 = arith.constant 0 : index
    %c0_9 = arith.constant 0 : index
    %9 = vector.load %arg5[%c0_7, %c0_8, %c0_9] : memref<2x8x256xf32, #tpu.memory_space<vmem>>, vector<1x8x256xf32>
    %10 = vector.shape_cast %9 : vector<1x8x256xf32> to vector<8x256xf32>
    %11 = vector.shape_cast %8 : vector<8x256xf32> to vector<1x8x256xf32>
    tpu.vector_store %arg5[%c0_7, %c0_8, %c0_9], %11 {strides = array<i32>} : memref<2x8x256xf32, #tpu.memory_space<vmem>>, vector<1x8x256xf32>,
    %c1 = arith.constant 1 : index
    %c0_10 = arith.constant 0 : index
    %c0_11 = arith.constant 0 : index
    %12 = vector.load %arg2[%c1, %c0_10, %c0_11] : memref<2x4x256xf32, #tpu.memory_space<vmem>>, vector<1x4x256xf32>
    %13 = vector.shape_cast %12 : vector<1x4x256xf32> to vector<4x256xf32>
    %cst_12 = arith.constant dense<0.000000e+00> : vector<8x256xf32>
    %14 = tpu.matmul %0, %13, %cst_12 {dimension_numbers = #tpu.dot_dimension_numbers<[1], [0], [0], [1], [0, 0, 1, 1], [], []>} : vector<8x4xf32>, vector<4x256xf32>, vector<8x256xf32> -> vector<8x256xf32>
    %15 = vector.broadcast %1 : vector<8x1xf32> to vector<8x256xf32>
    %16 = arith.addf %14, %15 : vector<8x256xf32>
    %cst_13 = arith.constant 0.000000e+00 : f32
    %17 = vector.broadcast %cst_13 : f32 to vector<8x256xf32>
    %18 = arith.maximumf %16, %17 : vector<8x256xf32>
    %c1_14 = arith.constant 1 : index
    %c0_15 = arith.constant 0 : index
    %c0_16 = arith.constant 0 : index
    %19 = vector.load %arg5[%c1_14, %c0_15, %c0_16] : memref<2x8x256xf32, #tpu.memory_space<vmem>>, vector<1x8x256xf32>
    %20 = vector.shape_cast %19 : vector<1x8x256xf32> to vector<8x256xf32>
    %21 = vector.shape_cast %18 : vector<8x256xf32> to vector<1x8x256xf32>
    tpu.vector_store %arg5[%c1_14, %c0_15, %c0_16], %21 {strides = array<i32>} : memref<2x8x256xf32, #tpu.memory_space<vmem>>, vector<1x8x256xf32>,
    return
  }
  func.func @transform_0(%arg0: i32, %arg1: i32) -> (i32, i32, i32) {
    %c0_i32 = arith.constant 0 : i32
    %c0_i32_0 = arith.constant 0 : i32
    return %arg0, %c0_i32, %arg1 : i32, i32, i32
  }
  func.func @transform_1(%arg0: i32, %arg1: i32) -> (i32, i32) {
    %c0_i32 = arith.constant 0 : i32
    %c0_i32_0 = arith.constant 0 : i32
    %c0_i32_1 = arith.constant 0 : i32
    return %c0_i32, %c0_i32_0 : i32, i32
  }
  func.func @transform_2(%arg0: i32, %arg1: i32) -> (i32, i32) {
    %c0_i32 = arith.constant 0 : i32
    %c0_i32_0 = arith.constant 0 : i32
    %c0_i32_1 = arith.constant 0 : i32
    return %c0_i32, %c0_i32_0 : i32, i32
  }
  func.func @transform_3(%arg0: i32, %arg1: i32) -> (i32, i32, i32) {
    %c0_i32 = arith.constant 0 : i32
    %c0_i32_0 = arith.constant 0 : i32
    return %arg0, %c0_i32, %arg1 : i32, i32, i32
  }
}

</mosaic_0001>

<bundles_post_ra>
// kernel: tpu_custom_call.1
= control target key start
LH: loop header
LB: loop body
LE: loop exit
PB: predicated region body
PF: predicated region fallthrough
CT: control target
= control target key end

     0   :  { %vm29_vm0 = vcmask 1043456   ;;  %v248_v4 = vmov 0.0   ;;  %s301_s0 = inlined_call_operand.vmem [shape: f32[2,4,256], index: 0, kind: input, shape index: {}]   ;;  %s302_s1 = inlined_call_operand.vmem [shape: f32[8,4], index: 1, kind: input, shape index: {}]   ;;  %s303_s2 = inlined_call_operand.vmem [shape: f32[8,1], index: 2, kind: input, shape index: {}]   ;;  %s304_s3 = inlined_call_operand.hbm [shape: f32[2,8,256], index: 3, kind: output, shape index: {}]  }
   0x1   :  { %v17_v0 = vld [vmem:[%s301_s0] sm:$0xff]  ;;  %v212_v1 = vld [vmem:[%s301_s0 + $0x8] sm:$0xff]  ;;  %98 = vmatprep.mubr.f32.mxu0 %v248_v4  ;;  %181 = vmatprep.mubr.f32.mxu1 %v248_v4 }
   0x2   :  { %v24_v2 = vcombine.high %v17_v0, %v17_v0  ;;  %v112_v3 = vcombine.high %v212_v1, %v212_v1 }
   0x3   :  { %8 = vsyncpa [#allocation3], 0  ;;  %v15_v5 = vld [vmem:[%s302_s1] sm:$0xff]  ;;  %vm25_vm1 = vcmask 31744   ;;  %v249_v6 = vmov 0   ;;  %s250_s0 = smov [#allocation2]  }
   0x4   :  { %221 = vset.pattern.permute.xlu0 %v249_v6  ;;  %209 = vmatprep.subr.msk.mxu0 %vm29_vm0, %v24_v2  ;;  %v16_v7 = vld [vmem:[%s303_s2] sm:$0xff]  ;;  %s198_s1 = sshll.u32 %s250_s0, 4  ;;  %s199_s1 = int_to_ptr.vmem [resolvable:$true] %s198_s1 }
   0x5   :  { %213 = vmatprep.subr.msk.mxu1 %vm29_vm0, %v112_v3  ;;  %210 = vmatpush1.msk.msra.mxu0 %vm29_vm0, %v17_v0  ;;  %s224_s2 = scalar_lea.vmem %s199_s1, 512  ;;  %p229_p1 = scmp.lt.s32.totalorder %s199_s1, %s199_s1 }
   0x6   :  { %214 = vmatpush1.msk.msra.mxu1 %vm29_vm0, %v212_v1  ;;  %211 = vmatmul.mubr.msk.f32.vlgmr.msra.gmra.mrb[0].mxu0 %vm25_vm1, %v15_v5  ;;  %p225_p0 = scmp.ne.s32.totalorder %s199_s1, %s224_s2  ;;  %p230_p2 = scmp.lt.s32.totalorder %s224_s2, %s224_s2 }
   0x7   :  { %215 = vmatmul.mubr.msk.f32.vlgmr.msra.gmra.mrb[0].mxu1 %vm25_vm1, %v15_v5  ;;  %20 = vperm.xlu0 %221, %v16_v7  }
   0x8   :  { %p231_p3 = por %p230_p2, %p229_p1 }
   0xa   :  { %p232_p4 = pnand %p231_p3, %p225_p0 }
  0x86   :  { %v21_v8 = vpop.permute.xlu0 %20 }
  0xd9   :  { %v100_v9 = vpop.f32.mrb[0].mxu0 }
  0xda   :  { %v183_v10 = vpop.f32.mrb[0].mxu1  ;;  %v101_v11 = vadd.f32 %v100_v9, %v21_v8  ;;  %v102_v13 = vpop.f32.mrb[1].mxu0 }
  0xdb   :  { %v184_v12 = vadd.f32 %v183_v10, %v21_v8  ;;  %v185_v14 = vpop.f32.mrb[1].mxu1  ;;  %v103_v15 = vadd.f32 %v102_v13, %v21_v8 }
  0xdc   :  { %v186_v16 = vadd.f32 %v185_v14, %v21_v8  ;;  %v105_v17 = vmax.f32 %v101_v11, 0.0 }
  0xdd   :  { %v188_v18 = vmax.f32 %v184_v12, 0.0  ;;  %v106_v19 = vmax.f32 %v103_v15, 0.0 }
  0xde   :  { %v189_v20 = vmax.f32 %v186_v16, 0.0  ;;  %107 = vst [vmem:[#allocation2] sm:$0xff] %v105_v17 }
  0xdf   :  { %191 = vst [vmem:[#allocation2 + $0x10] sm:$0xff] %v188_v18  ;;  %108 = vst [vmem:[#allocation2 + $0x8] sm:$0xff] %v106_v19 }
  0xe0   :  { %192 = vst [vmem:[#allocation2 + $0x18] sm:$0xff] %v189_v20 }
  0xe1   :  { %235 = shalt.err (!%p232_p4)
}
  0xe2   :  { %s236_s22 = scalar_lea.hbm %s304_s3, 512 }
  0xe3   :  { %p237_p5 = scmp.ne.s32.totalorder %s304_s3, %s236_s22  ;;  %p240_p6 = scmp.lt.u32.totalorder %s236_s22, %s304_s3 }
  0xe5   :  { %p242_p7 = pnand %p240_p6, %p237_p5 }
  0xe7   :  { %245 = shalt.err (!%p242_p7)
}
  0xe8   :  { %s251_s27 = smov 256   ;;  %s252_s28 = smov 16  }
  0xe9   :  { %204 = dma.vmem_to_hbm [thread:$0]  %s199_s1, 512, %s304_s3, [#allocation3], %s251_s27, %s251_s27, %s252_s28  }
  0xea   :  { %246 = dma.done.wait [#allocation3], 512  }
  0xeb   :  { %247 = vsyncadd [#allocation3], 4294966784 }
  0xec   :  { %208 = vsyncpa [#allocation3], 1 }

</bundles_post_ra>
